<compile_context>
chip_gen: v5e
topology: v5e:2x2
jax: 0.10.0
libtpu: 0.0.40
codegen_flags: <defaults>
</compile_context>

<pallas_src>
import math

import jax
import jax.numpy as jnp
from jax import lax
from jax.experimental import pallas as pl
from jax.experimental.pallas import tpu as pltpu


_VMEM_BUDGET = 28 * 1024 * 1024  # target tile footprint; fits all generations


def _round_up(n, m):
    return ((n + m - 1) // m) * m


def _pick_feature_tile(D, target):
    """Returns (tnk, Dp): square feature tile and padded feature size."""
    Dp0 = _round_up(D, 128)
    target = max(128, _round_up(target, 128))
    if Dp0 <= target:
        return Dp0, Dp0
    # Prefer a divisor of Dp0 that is a multiple of 128 and reasonably large.
    for t in range(target, 255, -128):
        if Dp0 % t == 0:
            return t, Dp0
    # No good divisor: pad D up to a multiple of 512 (padding beats collapsing
    # to 128-wide tiles, which multiplies grid steps and per-step overhead).
    return 512, _round_up(Dp0, 512)


def _feature_regression_kernel(x_ref, w_ref, d_ref, b_ref, o_ref, *scratch):
    j = pl.program_id(1)  # output-feature tile
    k = pl.program_id(2)  # reduction (input-feature) tile
    acc_ref = scratch[0] if scratch else o_ref  # f32 output doubles as accumulator

    @pl.when(k == 0)
    def _init():
        acc_ref[...] = jnp.zeros_like(acc_ref)

    # x (tm, tk) contracted with W (tn, tk) along their feature axes -> (tm, tn).
    # trans-B happens in-flight on the MXU; accumulation is f32.
    acc_ref[...] += lax.dot_general(
        x_ref[...], w_ref[...],
        dimension_numbers=(((1,), (1,)), ((), ())),
        preferred_element_type=jnp.float32,
    )

    # Diagonal correction: subtract x[:, c] * W[c, c].  Only the k == j step
    # touches the diagonal (tn == tk, so this tile's x columns line up exactly
    # with this output tile's columns).  Done in f32 into the accumulator.
    @pl.when(k == j)
    def _diag():
        acc_ref[...] -= (x_ref[...].astype(jnp.float32)
                         * d_ref[...].astype(jnp.float32))

    # Bias added exactly once, on the last reduction step.
    @pl.when(k == pl.num_programs(2) - 1)
    def _finalize():
        res = acc_ref[...] + b_ref[...].astype(jnp.float32)
        o_ref[...] = res.astype(o_ref.dtype)


def feature_regression(x, W, b, *, feature_tile=1024, compute_dtype=None,
                       w_buffers=2):
    """z_h = x @ (W * (1 - eye)).T + b as a tiled Pallas TPU matmul.

    x: (B, D), W: (D, D) (out_features, in_features), b: (D,).
    compute_dtype=jnp.bfloat16 stores/streams x and W at bf16 (f32 accumulation
    kept).  w_buffers > 2 adds extra W pipeline buffers (v5e exposed-DMA case).
    """
    B, D = x.shape
    out_dtype = x.dtype

    in_dtype = compute_dtype if compute_dtype is not None else x.dtype
    in_bytes = jnp.dtype(in_dtype).itemsize
    out_bytes = jnp.dtype(out_dtype).itemsize
    use_scratch = out_dtype != jnp.float32

    tnk, Dp = _pick_feature_tile(D, feature_tile)
    Bp = _round_up(B, 8)

    # VMEM footprint: W tiles (w_buffers) + small vectors + per-batch-row cost
    # (x + out double-buffered, optional f32 accumulator).
    fixed = w_buffers * tnk * tnk * in_bytes + 4 * tnk * (in_bytes + 4)
    per_row = 2 * tnk * in_bytes + 2 * tnk * out_bytes + (tnk * 4 if use_scratch else 0)
    avail = max(_VMEM_BUDGET - fixed, per_row * 8)
    tm_max = max(8, (avail // per_row) // 8 * 8)
    tm = min(Bp, tm_max)      # whole padded batch if it fits -> W streamed once
    Bp = _round_up(Bp, tm)

    # Keep both v7x TensorCores busy: if both parallel axes are degenerate,
    # split the out-feature axis (free: W traffic unchanged when grid_i == 1).
    if Bp // tm == 1 and Dp // tnk == 1 and Dp % 256 == 0:
        tnk = Dp // 2

    if (Bp, Dp) != (B, D):
        x = jnp.pad(x, ((0, Bp - B), (0, Dp - D)))
        W = jnp.pad(W, ((0, Dp - D), (0, Dp - D)))
        b = jnp.pad(b, (0, Dp - D))
    if compute_dtype is not None:
        # Cast once here so the HBM weight stream (and double buffer) shrinks.
        x = x.astype(compute_dtype)
        W = W.astype(compute_dtype)

    diag = jnp.diagonal(W).reshape(1, Dp)        # same dtype as the W fed to MXU
    b2d = b.astype(jnp.float32).reshape(1, Dp)

    grid = (Bp // tm, Dp // tnk, Dp // tnk)

    w_spec_kwargs = {}
    if w_buffers is not None and w_buffers > 2:
        w_spec_kwargs["pipeline_mode"] = pl.Buffered(w_buffers)

    in_specs = [
        pl.BlockSpec((tm, tnk), lambda i, j, k: (i, k)),                    # x
        pl.BlockSpec((tnk, tnk), lambda i, j, k: (j, k), **w_spec_kwargs),  # W
        pl.BlockSpec((1, tnk), lambda i, j, k: (0, j)),                     # diag(W)
        pl.BlockSpec((1, tnk), lambda i, j, k: (0, j)),                     # bias
    ]
    out_specs = pl.BlockSpec((tm, tnk), lambda i, j, k: (i, j))
    scratch_shapes = [pltpu.VMEM((tm, tnk), jnp.float32)] if use_scratch else []

    footprint = fixed + tm * per_row
    vmem_limit = int(min(48 << 20, max(footprint + (4 << 20), 16 << 20)))

    out = pl.pallas_call(
        _feature_regression_kernel,
        out_shape=jax.ShapeDtypeStruct((Bp, Dp), out_dtype),
        grid_spec=pltpu.PrefetchScalarGridSpec(
            num_scalar_prefetch=0,
            grid=grid,
            in_specs=in_specs,
            out_specs=out_specs,
            scratch_shapes=scratch_shapes,
        ),
        compiler_params=pltpu.CompilerParams(
            # batch / output-feature axes parallel (megacore on v7x),
            # reduction axis last + arbitrary (resident accumulator).
            dimension_semantics=("parallel", "parallel", "arbitrary"),
            vmem_limit_bytes=vmem_limit,
        ),
    )(x, W, diag, b2d)

    return out[:B, :D]


def init_params(key, input_size):
    """Deterministic init mirroring reset_parameters: U(-stdv, stdv)."""
    stdv = 1.0 / math.sqrt(input_size)
    kw, kb = jax.random.split(key)
    W = jax.random.uniform(
        kw, (input_size, input_size), jnp.float32, minval=-stdv, maxval=stdv)
    b = jax.random.uniform(
        kb, (input_size,), jnp.float32, minval=-stdv, maxval=stdv)
    return W, b


if __name__ == "__main__":
    key = jax.random.PRNGKey(0)
    k_x, k_p = jax.random.split(key)

    batch = 8
    input_size = 32
    # TODO(synk): at these tiny sizes a fused XLA dot beats any standalone
    # kernel; this shape just validates the tiled kernel structure.

    x = jax.random.normal(k_x, (batch, input_size), jnp.float32)
    W, b = init_params(k_p, input_size)

    out = jax.block_until_ready(feature_regression(x, W, b))

    # Reference check in plain JAX (same semantics as F.linear(x, W*m, b)).
    m = 1.0 - jnp.eye(input_size, dtype=jnp.float32)
    ref = x @ (W * m).T + b
    assert out.shape == (batch, input_size)
    assert jnp.allclose(out, ref, atol=1e-5, rtol=1e-5)

    print("KERNEL_OK")
</pallas_src>

<mosaic_0001>
module attributes {stable_mosaic.version = 11 : i64} {
  func.func @_feature_regression_kernel(%arg0: i32, %arg1: i32, %arg2: i32, %arg3: memref<8x128xf32, #tpu.memory_space<vmem>>, %arg4: memref<128x128xf32, #tpu.memory_space<vmem>>, %arg5: memref<1x128xf32, #tpu.memory_space<vmem>>, %arg6: memref<1x128xf32, #tpu.memory_space<vmem>>, %arg7: memref<8x128xf32, #tpu.memory_space<vmem>>) attributes {dimension_semantics = [#tpu.dimension_semantics<parallel>, #tpu.dimension_semantics<parallel>, #tpu.dimension_semantics<arbitrary>], iteration_bounds = array<i64: 1, 1, 1>, scalar_prefetch = 0 : i64, scratch_operands = 0 : i64, tpu.core_type = #tpu.core_type<tc>, window_params = [{transform_indices = @transform_0, window_bounds = array<i64: 8, 128>}, {transform_indices = @transform_1, window_bounds = array<i64: 128, 128>}, {transform_indices = @transform_2, window_bounds = array<i64: 1, 128>}, {transform_indices = @transform_3, window_bounds = array<i64: 1, 128>}, {transform_indices = @transform_4, window_bounds = array<i64: 8, 128>}]} {
    %c0_i32 = arith.constant 0 : i32
    %0 = arith.cmpi eq, %arg2, %c0_i32 : i32
    %1 = arith.extui %0 : i1 to i32
    %c0_i32_0 = arith.constant 0 : i32
    %2 = arith.cmpi ne, %1, %c0_i32_0 : i32
    scf.if %2 {
      %cst_11 = arith.constant 0.000000e+00 : f32
      %15 = vector.broadcast %cst_11 : f32 to vector<8x128xf32>
      %c0_12 = arith.constant 0 : index
      %c0_13 = arith.constant 0 : index
      %16 = vector.load %arg7[%c0_12, %c0_13] : memref<8x128xf32, #tpu.memory_space<vmem>>, vector<8x128xf32>
      tpu.vector_store %arg7[%c0_12, %c0_13], %15 {strides = array<i32>} : memref<8x128xf32, #tpu.memory_space<vmem>>, vector<8x128xf32>,
    } else {
    }
    %c0 = arith.constant 0 : index
    %c0_1 = arith.constant 0 : index
    %3 = vector.load %arg7[%c0, %c0_1] : memref<8x128xf32, #tpu.memory_space<vmem>>, vector<8x128xf32>
    %c0_2 = arith.constant 0 : index
    %c0_3 = arith.constant 0 : index
    %4 = vector.load %arg3[%c0_2, %c0_3] : memref<8x128xf32, #tpu.memory_space<vmem>>, vector<8x128xf32>
    %c0_4 = arith.constant 0 : index
    %c0_5 = arith.constant 0 : index
    %5 = vector.load %arg4[%c0_4, %c0_5] : memref<128x128xf32, #tpu.memory_space<vmem>>, vector<128x128xf32>
    %cst = arith.constant dense<0.000000e+00> : vector<8x128xf32>
    %6 = tpu.matmul %4, %5, %cst {dimension_numbers = #tpu.dot_dimension_numbers<[1], [1], [0], [0], [0, 0, 1, 0], [], []>} : vector<8x128xf32>, vector<128x128xf32>, vector<8x128xf32> -> vector<8x128xf32>
    %7 = arith.addf %3, %6 : vector<8x128xf32>
    %c0_6 = arith.constant 0 : index
    %c0_7 = arith.constant 0 : index
    %8 = vector.load %arg7[%c0_6, %c0_7] : memref<8x128xf32, #tpu.memory_space<vmem>>, vector<8x128xf32>
    tpu.vector_store %arg7[%c0_6, %c0_7], %7 {strides = array<i32>} : memref<8x128xf32, #tpu.memory_space<vmem>>, vector<8x128xf32>,
    %9 = arith.cmpi eq, %arg2, %arg1 : i32
    %10 = arith.extui %9 : i1 to i32
    %c0_i32_8 = arith.constant 0 : i32
    %11 = arith.cmpi ne, %10, %c0_i32_8 : i32
    scf.if %11 {
      %c0_11 = arith.constant 0 : index
      %c0_12 = arith.constant 0 : index
      %15 = vector.load %arg7[%c0_11, %c0_12] : memref<8x128xf32, #tpu.memory_space<vmem>>, vector<8x128xf32>
      %c0_13 = arith.constant 0 : index
      %c0_14 = arith.constant 0 : index
      %16 = vector.load %arg3[%c0_13, %c0_14] : memref<8x128xf32, #tpu.memory_space<vmem>>, vector<8x128xf32>
      %c0_15 = arith.constant 0 : index
      %c0_16 = arith.constant 0 : index
      %17 = vector.load %arg5[%c0_15, %c0_16] : memref<1x128xf32, #tpu.memory_space<vmem>>, vector<1x128xf32>
      %18 = vector.broadcast %17 : vector<1x128xf32> to vector<8x128xf32>
      %19 = arith.mulf %16, %18 : vector<8x128xf32>
      %20 = arith.subf %15, %19 : vector<8x128xf32>
      %c0_17 = arith.constant 0 : index
      %c0_18 = arith.constant 0 : index
      %21 = vector.load %arg7[%c0_17, %c0_18] : memref<8x128xf32, #tpu.memory_space<vmem>>, vector<8x128xf32>
      tpu.vector_store %arg7[%c0_17, %c0_18], %20 {strides = array<i32>} : memref<8x128xf32, #tpu.memory_space<vmem>>, vector<8x128xf32>,
    } else {
    }
    %c0_i32_9 = arith.constant 0 : i32
    %12 = arith.cmpi eq, %arg2, %c0_i32_9 : i32
    %13 = arith.extui %12 : i1 to i32
    %c0_i32_10 = arith.constant 0 : i32
    %14 = arith.cmpi ne, %13, %c0_i32_10 : i32
    scf.if %14 {
      %c0_11 = arith.constant 0 : index
      %c0_12 = arith.constant 0 : index
      %15 = vector.load %arg7[%c0_11, %c0_12] : memref<8x128xf32, #tpu.memory_space<vmem>>, vector<8x128xf32>
      %c0_13 = arith.constant 0 : index
      %c0_14 = arith.constant 0 : index
      %16 = vector.load %arg6[%c0_13, %c0_14] : memref<1x128xf32, #tpu.memory_space<vmem>>, vector<1x128xf32>
      %17 = vector.broadcast %16 : vector<1x128xf32> to vector<8x128xf32>
      %18 = arith.addf %15, %17 : vector<8x128xf32>
      %c0_15 = arith.constant 0 : index
      %c0_16 = arith.constant 0 : index
      %19 = vector.load %arg7[%c0_15, %c0_16] : memref<8x128xf32, #tpu.memory_space<vmem>>, vector<8x128xf32>
      tpu.vector_store %arg7[%c0_15, %c0_16], %18 {strides = array<i32>} : memref<8x128xf32, #tpu.memory_space<vmem>>, vector<8x128xf32>,
    } else {
    }
    return
  }
  func.func @transform_0(%arg0: i32, %arg1: i32, %arg2: i32) -> (i32, i32) {
    %c0_i32 = arith.constant 0 : i32
    return %arg0, %arg2 : i32, i32
  }
  func.func @transform_1(%arg0: i32, %arg1: i32, %arg2: i32) -> (i32, i32) {
    %c0_i32 = arith.constant 0 : i32
    return %arg1, %arg2 : i32, i32
  }
  func.func @transform_2(%arg0: i32, %arg1: i32, %arg2: i32) -> (i32, i32) {
    %c0_i32 = arith.constant 0 : i32
    %c0_i32_0 = arith.constant 0 : i32
    return %c0_i32, %arg1 : i32, i32
  }
  func.func @transform_3(%arg0: i32, %arg1: i32, %arg2: i32) -> (i32, i32) {
    %c0_i32 = arith.constant 0 : i32
    %c0_i32_0 = arith.constant 0 : i32
    return %c0_i32, %arg1 : i32, i32
  }
  func.func @transform_4(%arg0: i32, %arg1: i32, %arg2: i32) -> (i32, i32) {
    %c0_i32 = arith.constant 0 : i32
    return %arg0, %arg1 : i32, i32
  }
}

</mosaic_0001>

<bundles_post_ra>
// kernel: tpu_custom_call.1
= control target key start
LH: loop header
LB: loop body
LE: loop exit
PB: predicated region body
PF: predicated region fallthrough
CT: control target
= control target key end

     0   :  { %9 = vsyncpa [#allocation3], 0  ;;  %s265_s0 = inlined_call_operand.hbm [shape: f32[8,128], index: 0, kind: input, shape index: {}]   ;;  %s266_s1 = inlined_call_operand.hbm [shape: f32[128,128], index: 1, kind: input, shape index: {}]   ;;  %s267_s2 = inlined_call_operand.vmem [shape: f32[1,128], index: 2, kind: input, shape index: {}]   ;;  %s268_s3 = inlined_call_operand.vmem [shape: f32[1,128], index: 3, kind: input, shape index: {}]   ;;  %s269_s4 = inlined_call_operand.hbm [shape: f32[8,128], index: 4, kind: output, shape index: {}]  }
   0x1   :  { %10 = vsyncpa [#allocation6], 0 }
   0x2   :  { %11 = vsyncpa [#allocation4], 0  ;;  %s17_s17 = sshll.u32 %s265_s0, 4  ;;  %s220_s18 = smov [#allocation2]   ;;  %s18_s17 = int_to_ptr.hbm [resolvable:$true] %s17_s17 }
   0x3   :  { %s19_s19 = sshll.u32 %s220_s18, 4  ;;  %s27_s22 = sshll.u32 %s266_s1, 4  ;;  %s20_s19 = int_to_ptr.vmem [resolvable:$true] %s19_s19  ;;  %s28_s22 = int_to_ptr.hbm [resolvable:$true] %s27_s22 }
   0x4   :  { %22 = dma.hbm_to_vmem [thread:$0]  %s18_s17, 128, %s20_s19, [#allocation3]  }
   0x5   :  { %s221_s23 = smov [#allocation5]   ;;  %s222_s25 = smov 128  }
   0x6   :  { %s29_s24 = sshll.u32 %s221_s23, 4  ;;  %s223_s26 = smov 8   ;;  %s30_s24 = int_to_ptr.vmem [resolvable:$true] %s29_s24 }
   0x7   :  { %35 = dma.hbm_to_vmem [thread:$0]  %s28_s22, 2048, %s30_s24, [#allocation6], %s222_s25, %s222_s25, %s223_s26  }
   0x8   :  { %214 = dma.done.wait [#allocation3], 128  }
   0x9   :  { %215 = vsyncadd [#allocation3], 4294967168 }
   0xa   :  { %216 = dma.done.wait [#allocation6], 2048  }
   0xb   :  { %217 = vsyncadd [#allocation6], 4294965248  ;;  %v70_v0 = vld [vmem:[#allocation5 + $0x78] sm:$0xff]  ;;  %v69_v1 = vld [vmem:[#allocation5 + $0x70] sm:$0xff]  ;;  %s224_s29 = smov [#allocation7]   ;;  %s123_s7 = sshll.u32 %s269_s4, 4  ;;  %s124_s7 = int_to_ptr.hbm [resolvable:$true] %s123_s7 }
   0xc   :  { %71 = vmatpush.xpose.msra.mxu0 %v70_v0  ;;  %v68_v2 = vld [vmem:[#allocation5 + $0x68] sm:$0xff]  ;;  %v67_v3 = vld [vmem:[#allocation5 + $0x60] sm:$0xff]  ;;  %v66_v4 = vld [vmem:[#allocation5 + $0x58] sm:$0xff]  ;;  %s121_s30 = sshll.u32 %s224_s29, 4  ;;  %s122_s30 = int_to_ptr.vmem [resolvable:$true] %s121_s30 }
   0xd   :  { %v65_v5 = vld [vmem:[#allocation5 + $0x50] sm:$0xff]  ;;  %v64_v6 = vld [vmem:[#allocation5 + $0x48] sm:$0xff]  ;;  %v63_v7 = vld [vmem:[#allocation5 + $0x40] sm:$0xff] }
   0xe   :  { %v62_v8 = vld [vmem:[#allocation5 + $0x38] sm:$0xff]  ;;  %v61_v9 = vld [vmem:[#allocation5 + $0x30] sm:$0xff]  ;;  %v60_v10 = vld [vmem:[#allocation5 + $0x28] sm:$0xff] }
   0xf   :  { %v59_v11 = vld [vmem:[#allocation5 + $0x20] sm:$0xff]  ;;  %v58_v12 = vld [vmem:[#allocation5 + $0x18] sm:$0xff]  ;;  %v57_v13 = vld [vmem:[#allocation5 + $0x10] sm:$0xff] }
  0x10   :  { %72 = vmatpush.xpose.msra.mxu0 %v69_v1  ;;  %v56_v14 = vld [vmem:[#allocation5 + $0x8] sm:$0xff]  ;;  %v55_v15 = vld [vmem:[#allocation5] sm:$0xff]  ;;  %v54_v16 = vld [vmem:[#allocation2] sm:$0xff] }
  0x11   :  { %v140_v17 = vld [vmem:[%s267_s2] ss:$0 sm:$0xff] }
  0x12   :  { %v103_v18 = vmul.f32 %v140_v17, %v54_v16  ;;  %v141_v20 = vld [vmem:[%s268_s3] ss:$0 sm:$0xff] }
  0x14   :  { %73 = vmatpush.xpose.msra.mxu0 %v68_v2 }
  0x18   :  { %74 = vmatpush.xpose.msra.mxu0 %v67_v3 }
  0x1c   :  { %75 = vmatpush.xpose.msra.mxu0 %v66_v4 }
  0x20   :  { %76 = vmatpush.xpose.msra.mxu0 %v65_v5 }
  0x24   :  { %77 = vmatpush.xpose.msra.mxu0 %v64_v6 }
  0x28   :  { %78 = vmatpush.xpose.msra.mxu0 %v63_v7 }
  0x2c   :  { %79 = vmatpush.xpose.msra.mxu0 %v62_v8 }
  0x30   :  { %80 = vmatpush.xpose.msra.mxu0 %v61_v9 }
  0x34   :  { %81 = vmatpush.xpose.msra.mxu0 %v60_v10 }
  0x38   :  { %82 = vmatpush.xpose.msra.mxu0 %v59_v11 }
  0x3c   :  { %83 = vmatpush.xpose.msra.mxu0 %v58_v12 }
  0x40   :  { %84 = vmatpush.xpose.msra.mxu0 %v57_v13 }
  0x44   :  { %85 = vmatpush.xpose.msra.mxu0 %v56_v14 }
  0x48   :  { %86 = vmatpush.xpose.msra.mxu0 %v55_v15 }
  0x4b   :  { %87 = vmatmul.f32.vlgmr.msra.gmra.mxu0 %v54_v16 }
  0xc8   :  { %v88_v19 = vpop.f32.mrf.mxu0 }
  0xc9   :  { %v104_v21 = vsub.f32 %v88_v19, %v103_v18 }
  0xcb   :  { %v114_v22 = vadd.f32 %v141_v20, %v104_v21 }
  0xcd   :  { %115 = vst [vmem:[#allocation7] sm:$0xff] %v114_v22 }
  0xce   :  { %126 = dma.vmem_to_hbm [thread:$0]  %s122_s30, 128, %s124_s7, [#allocation4]  }
  0xcf   :  { %218 = dma.done.wait [#allocation4], 128  }
  0xd0   :  { %219 = vsyncadd [#allocation4], 4294967168 }
  0xd1   :  { %131 = vsyncpa [#allocation3], 1 }
  0xd2   :  { %132 = vsyncpa [#allocation6], 1 }
  0xd3   :  { %133 = vsyncpa [#allocation4], 1 }

</bundles_post_ra>
